<compile_context>
chip_gen: v7x
topology: tpu7x:2x2x1
jax: 0.10.0
libtpu: 0.0.40
codegen_flags: <defaults>
</compile_context>

<pallas_src>
import functools

import jax
import jax.numpy as jnp
import numpy as np
from jax import lax
from jax.experimental import pallas as pl
from jax.experimental.pallas import tpu as pltpu


# -----------------------------------------------------------------------------------
# Init-time packing: (K,K,Cin,Cout) conv weights -> K banded matrices acting on
# row-flattened, zero-padded image rows.
# -----------------------------------------------------------------------------------
def _pack_conv_weights(wt, bias, w_in, pad_out_cols):
    """Input rows hold (w_in + 2*pad)*Cin lanes: (padded column p, channel c).
    Output rows hold 2*blk*Cout lanes: [even-w half | odd-w half]; within a half,
    (block position q, channel co).  If pad_out_cols, q has `pad` zero columns on each
    side (so the W-pooled rows are already zero-padded for the next conv layer, which
    uses the same kernel size) and pooled column w2 sits at q = w2 + pad, else q = w2.
    """
    K, _, Cin, Cout = wt.shape
    pad = K // 2
    wp = w_in // 2                                     # pooled output width
    blk = wp + (2 * pad if pad_out_cols else 0)
    w_in_pad = w_in + 2 * pad
    big = np.zeros((K, w_in_pad * Cin, 2 * blk * Cout), np.float32)
    bias_big = np.zeros((2 * blk * Cout,), np.float32)
    wt = np.asarray(wt, np.float32)
    b = np.asarray(bias, np.float32)
    off = pad if pad_out_cols else 0
    for parity in range(2):
        for w2 in range(wp):
            w = 2 * w2 + parity                        # conv output column
            n0 = (parity * blk + w2 + off) * Cout
            bias_big[n0:n0 + Cout] = b
            for ky in range(K):
                for kx in range(K):
                    p = w + kx                         # padded input column
                    i0 = p * Cin
                    big[ky, i0:i0 + Cin, n0:n0 + Cout] += wt[ky, kx]
    return jnp.asarray(big), jnp.asarray(bias_big).reshape(1, -1)


# -----------------------------------------------------------------------------------
# The single fused kernel.
# -----------------------------------------------------------------------------------
def _net_forward_kernel(x_ref, w1_ref, b1_ref, w2_ref, b2_ref,
                        fw1_ref, fb1_ref, fw2_ref, fb2_ref, hw_ref, hb_ref,
                        o_ref, s1_ref, p2_ref, s2_ref,
                        *, B, H, W, C1, C2, K, head_sizes):
    pad = K // 2
    H1, W1 = H // 2, W // 2              # spatial size after conv1 + pool
    H2, W2 = H1 // 2, W1 // 2            # spatial size after conv2 + pool
    half1 = (W1 + 2 * pad) * C1          # conv1 output lanes per parity half (= conv2 row width)
    half2 = W2 * C2                      # conv2 output lanes per parity half

    # ---------------- conv1 + bias + ReLU + 2x2 max-pool ----------------
    acc = None
    for ky in range(K):                  # K lane-dense matmuls; batch folded into M
        lhs = x_ref[:, pl.ds(ky, H), :].reshape(B * H, x_ref.shape[2])
        term = jnp.dot(lhs, w1_ref[ky], preferred_element_type=jnp.float32)
        acc = term if acc is None else acc + term            # (B*H, 2*half1)
    y = jnp.maximum(acc + b1_ref[...], 0.0)                  # bias+ReLU (commute with max-pool)
    y = jnp.maximum(y[:, :half1], y[:, half1:])              # W-pool: even-w half vs odd-w half
    s1_ref[...] = y                                          # rows = (b, h)
    a1 = jnp.maximum(s1_ref[pl.ds(0, B * H1, stride=2), :],  # H-pool: even rows vs odd rows
                     s1_ref[pl.ds(1, B * H1, stride=2), :])  # (B*H1, half1)

    # ---------------- conv2 + bias + ReLU + 2x2 max-pool ----------------
    # a1 already carries conv2's zero W-padding columns; add the H padding rows here.
    p2_ref[...] = jnp.zeros_like(p2_ref)
    p2_ref[:, pl.ds(pad, H1), :] = a1.reshape(B, H1, half1)
    acc2 = None
    for ky in range(K):
        lhs = p2_ref[:, pl.ds(ky, H1), :].reshape(B * H1, half1)
        term = jnp.dot(lhs, w2_ref[ky], preferred_element_type=jnp.float32)
        acc2 = term if acc2 is None else acc2 + term         # (B*H1, 2*half2)
    y2 = jnp.maximum(acc2 + b2_ref[...], 0.0)
    y2 = jnp.maximum(y2[:, :half2], y2[:, half2:])           # W-pool
    s2_ref[...] = y2                                         # rows = (b, h1)

    # ---------- flatten (NHWC order) + fc1, with conv2's H-pool folded in ----------
    accf = None
    for h2 in range(H2):
        pooled = jnp.maximum(s2_ref[pl.ds(2 * h2, B, stride=H1), :],
                             s2_ref[pl.ds(2 * h2 + 1, B, stride=H1), :])   # (B, W2*C2)
        term = jnp.dot(pooled, fw1_ref[h2], preferred_element_type=jnp.float32)
        accf = term if accf is None else accf + term         # (B, numFC1)
    f = jnp.maximum(accf + fb1_ref[...], 0.0)
    f = jnp.maximum(jnp.dot(f, fw2_ref[...], preferred_element_type=jnp.float32)
                    + fb2_ref[...], 0.0)

    # -------- all task heads in one matmul + per-head log_softmax + concat --------
    z = jnp.dot(f, hw_ref[...], preferred_element_type=jnp.float32) + hb_ref[...]
    off = 0
    for nc in head_sizes:
        zi = z[:, off:off + nc]
        zi = zi - jnp.max(zi, axis=-1, keepdims=True)
        zi = zi - jnp.log(jnp.sum(jnp.exp(zi), axis=-1, keepdims=True))
        o_ref[:, off:off + nc] = zi.astype(o_ref.dtype)
        off += nc


# -----------------------------------------------------------------------------------
# Module wrapper (forward pass of prova.Net with deterministic synthetic parameters).
# -----------------------------------------------------------------------------------
class PallasNet:
    def __init__(self, key, image_size=16, image_channels=3, kernel=3,
                 numFM1=8, numFM2=16, numFC1=32, numFC2=32, task_classes=(10, 5)):
        assert image_size % 4 == 0 and kernel % 2 == 1   # two pool stages, 'same' padding
        H = W = image_size
        K = kernel
        C0, C1, C2 = image_channels, numFM1, numFM2
        H1, W1, H2, W2 = H // 2, W // 2, H // 4, W // 4
        fc1_in = C2 * H2 * W2
        n_tasks = len(task_classes)
        ks = jax.random.split(key, 8 + 2 * n_tasks)

        def winit(k, shape, fan_in):
            return jax.random.normal(k, shape, jnp.float32) / jnp.sqrt(float(fan_in))

        def binit(k, n):
            return 0.1 * jax.random.normal(k, (n,), jnp.float32)

        # ---- logical (PyTorch-equivalent) parameters; used by the pure-JAX reference ----
        self.conv1_w = winit(ks[0], (K, K, C0, C1), K * K * C0)      # HWIO
        self.conv1_b = binit(ks[1], C1)
        self.conv2_w = winit(ks[2], (K, K, C1, C2), K * K * C1)
        self.conv2_b = binit(ks[3], C2)
        # fc1 rows follow the kernel's NHWC flatten order (h2, w2, c2).  To port a real
        # PyTorch fc1.weight (NCHW flatten), permute its columns accordingly.
        self.fc1_w = winit(ks[4], (fc1_in, numFC1), fc1_in)
        self.fc1_b = binit(ks[5], numFC1)
        self.fc2_w = winit(ks[6], (numFC1, numFC2), numFC1)
        self.fc2_b = binit(ks[7], numFC2)
        self.task_ws = [winit(ks[8 + 2 * i], (numFC2, nc), numFC2)
                        for i, nc in enumerate(task_classes)]        # Net.add_task(...)
        self.task_bs = [binit(ks[9 + 2 * i], nc) for i, nc in enumerate(task_classes)]
        self.task_classes = tuple(int(nc) for nc in task_classes)
        self.current_tasks = list(range(n_tasks))                    # Net.set_tasks(all)

        # ---- kernel-ready packed parameters ----
        self.w1_big, self.b1_big = _pack_conv_weights(self.conv1_w, self.conv1_b, W,
                                                      pad_out_cols=True)
        self.w2_big, self.b2_big = _pack_conv_weights(self.conv2_w, self.conv2_b, W1,
                                                      pad_out_cols=False)
        self.fw1 = self.fc1_w.reshape(H2, W2 * C2, numFC1)           # h2-blocked fc1 weight
        self.fb1 = self.fc1_b.reshape(1, numFC1)
        self.fw2 = self.fc2_w
        self.fb2 = self.fc2_b.reshape(1, numFC2)
        self._dims = dict(H=H, W=W, C0=C0, C1=C1, C2=C2, K=K)

    def forward(self, x_nchw):
        d = self._dims
        H, W, C0, C1, C2, K = d["H"], d["W"], d["C0"], d["C1"], d["C2"], d["K"]
        pad = K // 2
        H1, W1, W2 = H // 2, W // 2, W // 4
        B = x_nchw.shape[0]
        assert tuple(x_nchw.shape[1:]) == (C0, H, W), x_nchw.shape

        head_sizes = tuple(self.task_classes[t] for t in self.current_tasks)
        hw = jnp.concatenate([self.task_ws[t] for t in self.current_tasks], axis=1)
        hb = jnp.concatenate([self.task_bs[t] for t in self.current_tasks], axis=0).reshape(1, -1)

        # Input prep (tiny one-time layout ops): NCHW -> zero-padded, row-flattened NHWC.
        x = jnp.transpose(x_nchw, (0, 2, 3, 1)).astype(jnp.float32)
        x = jnp.pad(x, ((0, 0), (pad, pad), (pad, pad), (0, 0)))
        x = x.reshape(B, H + 2 * pad, (W + 2 * pad) * C0)

        half1 = (W1 + 2 * pad) * C1
        half2 = W2 * C2
        kernel = functools.partial(_net_forward_kernel, B=B, H=H, W=W, C1=C1, C2=C2,
                                   K=K, head_sizes=head_sizes)
        return pl.pallas_call(
            kernel,
            out_shape=jax.ShapeDtypeStruct((B, int(sum(head_sizes))), jnp.float32),
            scratch_shapes=[
                pltpu.VMEM((B * H, half1), jnp.float32),              # conv1 W-pooled rows
                pltpu.VMEM((B, H1 + 2 * pad, half1), jnp.float32),    # conv2 padded input rows
                pltpu.VMEM((B * H1, half2), jnp.float32),             # conv2 W-pooled rows
            ],
        )(x, self.w1_big, self.b1_big, self.w2_big, self.b2_big,
          self.fw1, self.fb1, self.fw2, self.fb2, hw, hb)


# -----------------------------------------------------------------------------------
# Pure-JAX/XLA reference of the same forward pass (for numerical validation).
# -----------------------------------------------------------------------------------
def _reference_forward(net, x_nchw):
    hp = lax.Precision.HIGHEST
    x = jnp.transpose(x_nchw, (0, 2, 3, 1)).astype(jnp.float32)

    def conv_relu_pool(v, w, b):
        y = lax.conv_general_dilated(v, w, (1, 1), "SAME",
                                     dimension_numbers=("NHWC", "HWIO", "NHWC"),
                                     precision=hp)
        y = jnp.maximum(y + b.reshape(1, 1, 1, -1), 0.0)
        return lax.reduce_window(y, -jnp.inf, lax.max, (1, 2, 2, 1), (1, 2, 2, 1), "VALID")

    y = conv_relu_pool(x, net.conv1_w, net.conv1_b)
    y = conv_relu_pool(y, net.conv2_w, net.conv2_b)
    f = y.reshape(y.shape[0], -1)                         # NHWC flatten (matches fc1_w rows)
    f = jnp.maximum(jnp.dot(f, net.fc1_w, precision=hp) + net.fc1_b, 0.0)
    f = jnp.maximum(jnp.dot(f, net.fc2_w, precision=hp) + net.fc2_b, 0.0)
    outs = [jax.nn.log_softmax(jnp.dot(f, net.task_ws[t], precision=hp) + net.task_bs[t],
                               axis=-1)
            for t in net.current_tasks]
    return jnp.concatenate(outs, axis=1)


if __name__ == "__main__":
    key_params, key_x = jax.random.split(jax.random.PRNGKey(0))
    net = PallasNet(key_params)
    x = jax.random.normal(key_x, (2, 3, 16, 16), jnp.float32)     # NCHW, like the PyTorch module

    out = jax.block_until_ready(jax.jit(net.forward)(x))
    assert out.shape == (2, 15), out.shape

    # Each head is a log-softmax: per-head probabilities sum to 1 -> 2 per row total.
    row_prob_sum = jnp.exp(out).sum(axis=1)
    assert bool(jnp.all(jnp.abs(row_prob_sum - 2.0) < 1e-3)), row_prob_sum

    # Numerics vs a pure-JAX reference of the same module.
    ref = _reference_forward(net, x)
    max_err = float(jnp.max(jnp.abs(out - ref)))
    assert max_err < 5e-3, max_err

    print("KERNEL_OK")
</pallas_src>

<mosaic_0001>
module attributes {stable_mosaic.version = 11 : i64} {
  func.func @_net_forward_kernel(%arg0: memref<2x18x54xf32, #tpu.memory_space<vmem>>, %arg1: memref<3x54x160xf32, #tpu.memory_space<vmem>>, %arg2: memref<1x160xf32, #tpu.memory_space<vmem>>, %arg3: memref<3x80x128xf32, #tpu.memory_space<vmem>>, %arg4: memref<1x128xf32, #tpu.memory_space<vmem>>, %arg5: memref<4x64x32xf32, #tpu.memory_space<vmem>>, %arg6: memref<1x32xf32, #tpu.memory_space<vmem>>, %arg7: memref<32x32xf32, #tpu.memory_space<vmem>>, %arg8: memref<1x32xf32, #tpu.memory_space<vmem>>, %arg9: memref<32x15xf32, #tpu.memory_space<vmem>>, %arg10: memref<1x15xf32, #tpu.memory_space<vmem>>, %arg11: memref<2x15xf32, #tpu.memory_space<vmem>>, %arg12: memref<32x80xf32, #tpu.memory_space<vmem>>, %arg13: memref<2x10x80xf32, #tpu.memory_space<vmem>>, %arg14: memref<16x64xf32, #tpu.memory_space<vmem>>) attributes {dimension_semantics = [], scalar_prefetch = 0 : i64, scratch_operands = 3 : i64, tpu.core_type = #tpu.core_type<tc>} {
    %c0 = arith.constant 0 : index
    %c0_0 = arith.constant 0 : index
    %c0_1 = arith.constant 0 : index
    %0 = vector.load %arg0[%c0, %c0_0, %c0_1] : memref<2x18x54xf32, #tpu.memory_space<vmem>>, vector<2x16x54xf32>
    %1 = vector.shape_cast %0 : vector<2x16x54xf32> to vector<32x54xf32>
    %c0_2 = arith.constant 0 : index
    %c0_3 = arith.constant 0 : index
    %c0_4 = arith.constant 0 : index
    %2 = vector.load %arg1[%c0_2, %c0_3, %c0_4] : memref<3x54x160xf32, #tpu.memory_space<vmem>>, vector<1x54x160xf32>
    %3 = vector.shape_cast %2 : vector<1x54x160xf32> to vector<54x160xf32>
    %cst = arith.constant dense<0.000000e+00> : vector<32x160xf32>
    %4 = tpu.matmul %1, %3, %cst {dimension_numbers = #tpu.dot_dimension_numbers<[1], [0], [0], [1], [0, 0, 1, 1], [], []>} : vector<32x54xf32>, vector<54x160xf32>, vector<32x160xf32> -> vector<32x160xf32>
    %c0_5 = arith.constant 0 : index
    %c1 = arith.constant 1 : index
    %c0_6 = arith.constant 0 : index
    %5 = vector.load %arg0[%c0_5, %c1, %c0_6] : memref<2x18x54xf32, #tpu.memory_space<vmem>>, vector<2x16x54xf32>
    %6 = vector.shape_cast %5 : vector<2x16x54xf32> to vector<32x54xf32>
    %c1_7 = arith.constant 1 : index
    %c0_8 = arith.constant 0 : index
    %c0_9 = arith.constant 0 : index
    %7 = vector.load %arg1[%c1_7, %c0_8, %c0_9] : memref<3x54x160xf32, #tpu.memory_space<vmem>>, vector<1x54x160xf32>
    %8 = vector.shape_cast %7 : vector<1x54x160xf32> to vector<54x160xf32>
    %cst_10 = arith.constant dense<0.000000e+00> : vector<32x160xf32>
    %9 = tpu.matmul %6, %8, %cst_10 {dimension_numbers = #tpu.dot_dimension_numbers<[1], [0], [0], [1], [0, 0, 1, 1], [], []>} : vector<32x54xf32>, vector<54x160xf32>, vector<32x160xf32> -> vector<32x160xf32>
    %10 = arith.addf %4, %9 : vector<32x160xf32>
    %c0_11 = arith.constant 0 : index
    %c2 = arith.constant 2 : index
    %c0_12 = arith.constant 0 : index
    %11 = vector.load %arg0[%c0_11, %c2, %c0_12] : memref<2x18x54xf32, #tpu.memory_space<vmem>>, vector<2x16x54xf32>
    %12 = vector.shape_cast %11 : vector<2x16x54xf32> to vector<32x54xf32>
    %c2_13 = arith.constant 2 : index
    %c0_14 = arith.constant 0 : index
    %c0_15 = arith.constant 0 : index
    %13 = vector.load %arg1[%c2_13, %c0_14, %c0_15] : memref<3x54x160xf32, #tpu.memory_space<vmem>>, vector<1x54x160xf32>
    %14 = vector.shape_cast %13 : vector<1x54x160xf32> to vector<54x160xf32>
    %cst_16 = arith.constant dense<0.000000e+00> : vector<32x160xf32>
    %15 = tpu.matmul %12, %14, %cst_16 {dimension_numbers = #tpu.dot_dimension_numbers<[1], [0], [0], [1], [0, 0, 1, 1], [], []>} : vector<32x54xf32>, vector<54x160xf32>, vector<32x160xf32> -> vector<32x160xf32>
    %16 = arith.addf %10, %15 : vector<32x160xf32>
    %c0_17 = arith.constant 0 : index
    %c0_18 = arith.constant 0 : index
    %17 = vector.load %arg2[%c0_17, %c0_18] : memref<1x160xf32, #tpu.memory_space<vmem>>, vector<1x160xf32>
    %18 = vector.broadcast %17 : vector<1x160xf32> to vector<32x160xf32>
    %19 = arith.addf %16, %18 : vector<32x160xf32>
    %cst_19 = arith.constant 0.000000e+00 : f32
    %20 = vector.broadcast %cst_19 : f32 to vector<32x160xf32>
    %21 = arith.maximumf %19, %20 : vector<32x160xf32>
    %22 = vector.extract_strided_slice %21 {offsets = [0, 0], sizes = [32, 80], strides = [1, 1]} : vector<32x160xf32> to vector<32x80xf32>
    %23 = vector.extract_strided_slice %21 {offsets = [0, 80], sizes = [32, 80], strides = [1, 1]} : vector<32x160xf32> to vector<32x80xf32>
    %24 = arith.maximumf %22, %23 : vector<32x80xf32>
    %c0_20 = arith.constant 0 : index
    %c0_21 = arith.constant 0 : index
    %25 = vector.load %arg12[%c0_20, %c0_21] : memref<32x80xf32, #tpu.memory_space<vmem>>, vector<32x80xf32>
    tpu.vector_store %arg12[%c0_20, %c0_21], %24 {strides = array<i32>} : memref<32x80xf32, #tpu.memory_space<vmem>>, vector<32x80xf32>,
    %c0_22 = arith.constant 0 : index
    %c0_23 = arith.constant 0 : index
    %26 = tpu.strided_load %arg12[%c0_22, %c0_23] {strides = array<i32: 2, 1>} : memref<32x80xf32, #tpu.memory_space<vmem>>, vector<16x80xf32>
    %c1_24 = arith.constant 1 : index
    %c0_25 = arith.constant 0 : index
    %27 = tpu.strided_load %arg12[%c1_24, %c0_25] {strides = array<i32: 2, 1>} : memref<32x80xf32, #tpu.memory_space<vmem>>, vector<16x80xf32>
    %28 = arith.maximumf %26, %27 : vector<16x80xf32>
    %cst_26 = arith.constant 0.000000e+00 : f32
    %29 = vector.broadcast %cst_26 : f32 to vector<2x10x80xf32>
    %c0_27 = arith.constant 0 : index
    %c0_28 = arith.constant 0 : index
    %c0_29 = arith.constant 0 : index
    %30 = vector.load %arg13[%c0_27, %c0_28, %c0_29] : memref<2x10x80xf32, #tpu.memory_space<vmem>>, vector<2x10x80xf32>
    tpu.vector_store %arg13[%c0_27, %c0_28, %c0_29], %29 {strides = array<i32>} : memref<2x10x80xf32, #tpu.memory_space<vmem>>, vector<2x10x80xf32>,
    %31 = vector.shape_cast %28 : vector<16x80xf32> to vector<2x8x80xf32>
    %c0_30 = arith.constant 0 : index
    %c1_31 = arith.constant 1 : index
    %c0_32 = arith.constant 0 : index
    %32 = vector.load %arg13[%c0_30, %c1_31, %c0_32] : memref<2x10x80xf32, #tpu.memory_space<vmem>>, vector<2x8x80xf32>
    tpu.vector_store %arg13[%c0_30, %c1_31, %c0_32], %31 {strides = array<i32>} : memref<2x10x80xf32, #tpu.memory_space<vmem>>, vector<2x8x80xf32>,
    %c0_33 = arith.constant 0 : index
    %c0_34 = arith.constant 0 : index
    %c0_35 = arith.constant 0 : index
    %33 = vector.load %arg13[%c0_33, %c0_34, %c0_35] : memref<2x10x80xf32, #tpu.memory_space<vmem>>, vector<2x8x80xf32>
    %34 = vector.shape_cast %33 : vector<2x8x80xf32> to vector<16x80xf32>
    %c0_36 = arith.constant 0 : index
    %c0_37 = arith.constant 0 : index
    %c0_38 = arith.constant 0 : index
    %35 = vector.load %arg3[%c0_36, %c0_37, %c0_38] : memref<3x80x128xf32, #tpu.memory_space<vmem>>, vector<1x80x128xf32>
    %36 = vector.shape_cast %35 : vector<1x80x128xf32> to vector<80x128xf32>
    %cst_39 = arith.constant dense<0.000000e+00> : vector<16x128xf32>
    %37 = tpu.matmul %34, %36, %cst_39 {dimension_numbers = #tpu.dot_dimension_numbers<[1], [0], [0], [1], [0, 0, 1, 1], [], []>} : vector<16x80xf32>, vector<80x128xf32>, vector<16x128xf32> -> vector<16x128xf32>
    %c0_40 = arith.constant 0 : index
    %c1_41 = arith.constant 1 : index
    %c0_42 = arith.constant 0 : index
    %38 = vector.load %arg13[%c0_40, %c1_41, %c0_42] : memref<2x10x80xf32, #tpu.memory_space<vmem>>, vector<2x8x80xf32>
    %39 = vector.shape_cast %38 : vector<2x8x80xf32> to vector<16x80xf32>
    %c1_43 = arith.constant 1 : index
    %c0_44 = arith.constant 0 : index
    %c0_45 = arith.constant 0 : index
    %40 = vector.load %arg3[%c1_43, %c0_44, %c0_45] : memref<3x80x128xf32, #tpu.memory_space<vmem>>, vector<1x80x128xf32>
    %41 = vector.shape_cast %40 : vector<1x80x128xf32> to vector<80x128xf32>
    %cst_46 = arith.constant dense<0.000000e+00> : vector<16x128xf32>
    %42 = tpu.matmul %39, %41, %cst_46 {dimension_numbers = #tpu.dot_dimension_numbers<[1], [0], [0], [1], [0, 0, 1, 1], [], []>} : vector<16x80xf32>, vector<80x128xf32>, vector<16x128xf32> -> vector<16x128xf32>
    %43 = arith.addf %37, %42 : vector<16x128xf32>
    %c0_47 = arith.constant 0 : index
    %c2_48 = arith.constant 2 : index
    %c0_49 = arith.constant 0 : index
    %44 = vector.load %arg13[%c0_47, %c2_48, %c0_49] : memref<2x10x80xf32, #tpu.memory_space<vmem>>, vector<2x8x80xf32>
    %45 = vector.shape_cast %44 : vector<2x8x80xf32> to vector<16x80xf32>
    %c2_50 = arith.constant 2 : index
    %c0_51 = arith.constant 0 : index
    %c0_52 = arith.constant 0 : index
    %46 = vector.load %arg3[%c2_50, %c0_51, %c0_52] : memref<3x80x128xf32, #tpu.memory_space<vmem>>, vector<1x80x128xf32>
    %47 = vector.shape_cast %46 : vector<1x80x128xf32> to vector<80x128xf32>
    %cst_53 = arith.constant dense<0.000000e+00> : vector<16x128xf32>
    %48 = tpu.matmul %45, %47, %cst_53 {dimension_numbers = #tpu.dot_dimension_numbers<[1], [0], [0], [1], [0, 0, 1, 1], [], []>} : vector<16x80xf32>, vector<80x128xf32>, vector<16x128xf32> -> vector<16x128xf32>
    %49 = arith.addf %43, %48 : vector<16x128xf32>
    %c0_54 = arith.constant 0 : index
    %c0_55 = arith.constant 0 : index
    %50 = vector.load %arg4[%c0_54, %c0_55] : memref<1x128xf32, #tpu.memory_space<vmem>>, vector<1x128xf32>
    %51 = vector.broadcast %50 : vector<1x128xf32> to vector<16x128xf32>
    %52 = arith.addf %49, %51 : vector<16x128xf32>
    %cst_56 = arith.constant 0.000000e+00 : f32
    %53 = vector.broadcast %cst_56 : f32 to vector<16x128xf32>
    %54 = arith.maximumf %52, %53 : vector<16x128xf32>
    %55 = vector.extract_strided_slice %54 {offsets = [0, 0], sizes = [16, 64], strides = [1, 1]} : vector<16x128xf32> to vector<16x64xf32>
    %56 = vector.extract_strided_slice %54 {offsets = [0, 64], sizes = [16, 64], strides = [1, 1]} : vector<16x128xf32> to vector<16x64xf32>
    %57 = arith.maximumf %55, %56 : vector<16x64xf32>
    %c0_57 = arith.constant 0 : index
    %c0_58 = arith.constant 0 : index
    %58 = vector.load %arg14[%c0_57, %c0_58] : memref<16x64xf32, #tpu.memory_space<vmem>>, vector<16x64xf32>
    tpu.vector_store %arg14[%c0_57, %c0_58], %57 {strides = array<i32>} : memref<16x64xf32, #tpu.memory_space<vmem>>, vector<16x64xf32>,
    %c0_59 = arith.constant 0 : index
    %c0_60 = arith.constant 0 : index
    %59 = tpu.strided_load %arg14[%c0_59, %c0_60] {strides = array<i32: 8, 1>} : memref<16x64xf32, #tpu.memory_space<vmem>>, vector<2x64xf32>
    %c1_61 = arith.constant 1 : index
    %c0_62 = arith.constant 0 : index
    %60 = tpu.strided_load %arg14[%c1_61, %c0_62] {strides = array<i32: 8, 1>} : memref<16x64xf32, #tpu.memory_space<vmem>>, vector<2x64xf32>
    %61 = arith.maximumf %59, %60 : vector<2x64xf32>
    %c0_63 = arith.constant 0 : index
    %c0_64 = arith.constant 0 : index
    %c0_65 = arith.constant 0 : index
    %62 = vector.load %arg5[%c0_63, %c0_64, %c0_65] : memref<4x64x32xf32, #tpu.memory_space<vmem>>, vector<1x64x32xf32>
    %63 = vector.shape_cast %62 : vector<1x64x32xf32> to vector<64x32xf32>
    %cst_66 = arith.constant dense<0.000000e+00> : vector<2x32xf32>
    %64 = tpu.matmul %61, %63, %cst_66 {dimension_numbers = #tpu.dot_dimension_numbers<[1], [0], [0], [1], [0, 0, 1, 1], [], []>} : vector<2x64xf32>, vector<64x32xf32>, vector<2x32xf32> -> vector<2x32xf32>
    %c2_67 = arith.constant 2 : index
    %c0_68 = arith.constant 0 : index
    %65 = tpu.strided_load %arg14[%c2_67, %c0_68] {strides = array<i32: 8, 1>} : memref<16x64xf32, #tpu.memory_space<vmem>>, vector<2x64xf32>
    %c3 = arith.constant 3 : index
    %c0_69 = arith.constant 0 : index
    %66 = tpu.strided_load %arg14[%c3, %c0_69] {strides = array<i32: 8, 1>} : memref<16x64xf32, #tpu.memory_space<vmem>>, vector<2x64xf32>
    %67 = arith.maximumf %65, %66 : vector<2x64xf32>
    %c1_70 = arith.constant 1 : index
    %c0_71 = arith.constant 0 : index
    %c0_72 = arith.constant 0 : index
    %68 = vector.load %arg5[%c1_70, %c0_71, %c0_72] : memref<4x64x32xf32, #tpu.memory_space<vmem>>, vector<1x64x32xf32>
    %69 = vector.shape_cast %68 : vector<1x64x32xf32> to vector<64x32xf32>
    %cst_73 = arith.constant dense<0.000000e+00> : vector<2x32xf32>
    %70 = tpu.matmul %67, %69, %cst_73 {dimension_numbers = #tpu.dot_dimension_numbers<[1], [0], [0], [1], [0, 0, 1, 1], [], []>} : vector<2x64xf32>, vector<64x32xf32>, vector<2x32xf32> -> vector<2x32xf32>
    %71 = arith.addf %64, %70 : vector<2x32xf32>
    %c4 = arith.constant 4 : index
    %c0_74 = arith.constant 0 : index
    %72 = tpu.strided_load %arg14[%c4, %c0_74] {strides = array<i32: 8, 1>} : memref<16x64xf32, #tpu.memory_space<vmem>>, vector<2x64xf32>
    %c5 = arith.constant 5 : index
    %c0_75 = arith.constant 0 : index
    %73 = tpu.strided_load %arg14[%c5, %c0_75] {strides = array<i32: 8, 1>} : memref<16x64xf32, #tpu.memory_space<vmem>>, vector<2x64xf32>
    %74 = arith.maximumf %72, %73 : vector<2x64xf32>
    %c2_76 = arith.constant 2 : index
    %c0_77 = arith.constant 0 : index
    %c0_78 = arith.constant 0 : index
    %75 = vector.load %arg5[%c2_76, %c0_77, %c0_78] : memref<4x64x32xf32, #tpu.memory_space<vmem>>, vector<1x64x32xf32>
    %76 = vector.shape_cast %75 : vector<1x64x32xf32> to vector<64x32xf32>
    %cst_79 = arith.constant dense<0.000000e+00> : vector<2x32xf32>
    %77 = tpu.matmul %74, %76, %cst_79 {dimension_numbers = #tpu.dot_dimension_numbers<[1], [0], [0], [1], [0, 0, 1, 1], [], []>} : vector<2x64xf32>, vector<64x32xf32>, vector<2x32xf32> -> vector<2x32xf32>
    %78 = arith.addf %71, %77 : vector<2x32xf32>
    %c6 = arith.constant 6 : index
    %c0_80 = arith.constant 0 : index
    %79 = tpu.strided_load %arg14[%c6, %c0_80] {strides = array<i32: 8, 1>} : memref<16x64xf32, #tpu.memory_space<vmem>>, vector<2x64xf32>
    %c7 = arith.constant 7 : index
    %c0_81 = arith.constant 0 : index
    %80 = tpu.strided_load %arg14[%c7, %c0_81] {strides = array<i32: 8, 1>} : memref<16x64xf32, #tpu.memory_space<vmem>>, vector<2x64xf32>
    %81 = arith.maximumf %79, %80 : vector<2x64xf32>
    %c3_82 = arith.constant 3 : index
    %c0_83 = arith.constant 0 : index
    %c0_84 = arith.constant 0 : index
    %82 = vector.load %arg5[%c3_82, %c0_83, %c0_84] : memref<4x64x32xf32, #tpu.memory_space<vmem>>, vector<1x64x32xf32>
    %83 = vector.shape_cast %82 : vector<1x64x32xf32> to vector<64x32xf32>
    %cst_85 = arith.constant dense<0.000000e+00> : vector<2x32xf32>
    %84 = tpu.matmul %81, %83, %cst_85 {dimension_numbers = #tpu.dot_dimension_numbers<[1], [0], [0], [1], [0, 0, 1, 1], [], []>} : vector<2x64xf32>, vector<64x32xf32>, vector<2x32xf32> -> vector<2x32xf32>
    %85 = arith.addf %78, %84 : vector<2x32xf32>
    %c0_86 = arith.constant 0 : index
    %c0_87 = arith.constant 0 : index
    %86 = vector.load %arg6[%c0_86, %c0_87] : memref<1x32xf32, #tpu.memory_space<vmem>>, vector<1x32xf32>
    %87 = vector.broadcast %86 : vector<1x32xf32> to vector<2x32xf32>
    %88 = arith.addf %85, %87 : vector<2x32xf32>
    %cst_88 = arith.constant 0.000000e+00 : f32
    %89 = vector.broadcast %cst_88 : f32 to vector<2x32xf32>
    %90 = arith.maximumf %88, %89 : vector<2x32xf32>
    %c0_89 = arith.constant 0 : index
    %c0_90 = arith.constant 0 : index
    %91 = vector.load %arg7[%c0_89, %c0_90] : memref<32x32xf32, #tpu.memory_space<vmem>>, vector<32x32xf32>
    %cst_91 = arith.constant dense<0.000000e+00> : vector<2x32xf32>
    %92 = tpu.matmul %90, %91, %cst_91 {dimension_numbers = #tpu.dot_dimension_numbers<[1], [0], [0], [1], [0, 0, 1, 1], [], []>} : vector<2x32xf32>, vector<32x32xf32>, vector<2x32xf32> -> vector<2x32xf32>
    %c0_92 = arith.constant 0 : index
    %c0_93 = arith.constant 0 : index
    %93 = vector.load %arg8[%c0_92, %c0_93] : memref<1x32xf32, #tpu.memory_space<vmem>>, vector<1x32xf32>
    %94 = vector.broadcast %93 : vector<1x32xf32> to vector<2x32xf32>
    %95 = arith.addf %92, %94 : vector<2x32xf32>
    %cst_94 = arith.constant 0.000000e+00 : f32
    %96 = vector.broadcast %cst_94 : f32 to vector<2x32xf32>
    %97 = arith.maximumf %95, %96 : vector<2x32xf32>
    %c0_95 = arith.constant 0 : index
    %c0_96 = arith.constant 0 : index
    %98 = vector.load %arg9[%c0_95, %c0_96] : memref<32x15xf32, #tpu.memory_space<vmem>>, vector<32x15xf32>
    %cst_97 = arith.constant dense<0.000000e+00> : vector<2x15xf32>
    %99 = tpu.matmul %97, %98, %cst_97 {dimension_numbers = #tpu.dot_dimension_numbers<[1], [0], [0], [1], [0, 0, 1, 1], [], []>} : vector<2x32xf32>, vector<32x15xf32>, vector<2x15xf32> -> vector<2x15xf32>
    %c0_98 = arith.constant 0 : index
    %c0_99 = arith.constant 0 : index
    %100 = vector.load %arg10[%c0_98, %c0_99] : memref<1x15xf32, #tpu.memory_space<vmem>>, vector<1x15xf32>
    %101 = vector.broadcast %100 : vector<1x15xf32> to vector<2x15xf32>
    %102 = arith.addf %99, %101 : vector<2x15xf32>
    %103 = vector.extract_strided_slice %102 {offsets = [0, 0], sizes = [2, 10], strides = [1, 1]} : vector<2x15xf32> to vector<2x10xf32>
    %cst_100 = arith.constant dense<0xFF800000> : vector<2xf32>
    %104 = vector.multi_reduction <maximumf>, %103, %cst_100 [1] : vector<2x10xf32> to vector<2xf32>
    %105 = vector.shape_cast %104 : vector<2xf32> to vector<2x1xf32>
    %106 = vector.broadcast %105 : vector<2x1xf32> to vector<2x10xf32>
    %107 = arith.subf %103, %106 : vector<2x10xf32>
    %108 = math.exp %107 : vector<2x10xf32>
    %cst_101 = arith.constant dense<0.000000e+00> : vector<2xf32>
    %109 = vector.multi_reduction <add>, %108, %cst_101 [1] : vector<2x10xf32> to vector<2xf32>
    %110 = vector.shape_cast %109 : vector<2xf32> to vector<2x1xf32>
    %111 = math.log %110 : vector<2x1xf32>
    %112 = vector.broadcast %111 : vector<2x1xf32> to vector<2x10xf32>
    %113 = arith.subf %107, %112 : vector<2x10xf32>
    %c0_102 = arith.constant 0 : index
    %c0_103 = arith.constant 0 : index
    %114 = vector.load %arg11[%c0_102, %c0_103] : memref<2x15xf32, #tpu.memory_space<vmem>>, vector<2x10xf32>
    tpu.vector_store %arg11[%c0_102, %c0_103], %113 {strides = array<i32>} : memref<2x15xf32, #tpu.memory_space<vmem>>, vector<2x10xf32>,
    %115 = vector.extract_strided_slice %102 {offsets = [0, 10], sizes = [2, 5], strides = [1, 1]} : vector<2x15xf32> to vector<2x5xf32>
    %cst_104 = arith.constant dense<0xFF800000> : vector<2xf32>
    %116 = vector.multi_reduction <maximumf>, %115, %cst_104 [1] : vector<2x5xf32> to vector<2xf32>
    %117 = vector.shape_cast %116 : vector<2xf32> to vector<2x1xf32>
    %118 = vector.broadcast %117 : vector<2x1xf32> to vector<2x5xf32>
    %119 = arith.subf %115, %118 : vector<2x5xf32>
    %120 = math.exp %119 : vector<2x5xf32>
    %cst_105 = arith.constant dense<0.000000e+00> : vector<2xf32>
    %121 = vector.multi_reduction <add>, %120, %cst_105 [1] : vector<2x5xf32> to vector<2xf32>
    %122 = vector.shape_cast %121 : vector<2xf32> to vector<2x1xf32>
    %123 = math.log %122 : vector<2x1xf32>
    %124 = vector.broadcast %123 : vector<2x1xf32> to vector<2x5xf32>
    %125 = arith.subf %119, %124 : vector<2x5xf32>
    %c0_106 = arith.constant 0 : index
    %c10 = arith.constant 10 : index
    %126 = vector.load %arg11[%c0_106, %c10] : memref<2x15xf32, #tpu.memory_space<vmem>>, vector<2x5xf32>
    tpu.vector_store %arg11[%c0_106, %c10], %125 {strides = array<i32>} : memref<2x15xf32, #tpu.memory_space<vmem>>, vector<2x5xf32>,
    return
  }
}

</mosaic_0001>

<bundles_post_ra>
// kernel: forward.1
= control target key start
LH: loop header
LB: loop body
LE: loop exit
PB: predicated region body
PF: predicated region fallthrough
CT: control target
= control target key end

     0   :  { %16 = vsyncpa [#allocation6], 0  ;;  %s2424_s0 = inlined_call_operand.vmem [shape: f32[2,18,54], index: 0, kind: input, shape index: {}]   ;;  %s2425_s1 = inlined_call_operand.vmem [shape: f32[3,54,160], index: 1, kind: input, shape index: {}]   ;;  %s2426_s2 = inlined_call_operand.vmem [shape: f32[1,160], index: 2, kind: input, shape index: {}]   ;;  %s2427_s3 = inlined_call_operand.hbm [shape: f32[3,80,128], index: 3, kind: input, shape index: {}]   ;;  %s2428_s4 = inlined_call_operand.vmem [shape: f32[1,128], index: 4, kind: input, shape index: {}]   ;;  %s2429_s5 = inlined_call_operand.hbm [shape: f32[4,64,32], index: 5, kind: input, shape index: {}]   ;;  %s2430_s6 = inlined_call_operand.vmem [shape: f32[1,32], index: 6, kind: input, shape index: {}]   ;;  %s2431_s7 = inlined_call_operand.vmem [shape: f32[32,32], index: 7, kind: input, shape index: {}]   ;;  %s2432_s8 = inlined_call_operand.vmem [shape: f32[1,32], index: 8, kind: input, shape index: {}]   ;;  %s2433_s9 = inlined_call_operand.vmem [shape: f32[32,15], index: 9, kind: input, shape index: {}]   ;;  %s2434_s10 = inlined_call_operand.vmem [shape: f32[1,15], index: 10, kind: input, shape index: {}]   ;;  %s2435_s11 = inlined_call_operand.hbm [shape: f32[2,15], index: 11, kind: output, shape index: {}]  }
   0x1   :  { %17 = vsyncpa [#allocation9], 0 }
   0x2   :  { %18 = vsyncpa [#allocation7], 0  ;;  %s2001_s17 = smov [#allocation5]   ;;  %s1929_s21 = scalar_lea.hbm %s2427_s3, 3840 }
   0x3   :  { %s30_s18 = sshll.u32 %s2001_s17, 4  ;;  %p1930_p0 = scmp.ne.s32.totalorder %s2427_s3, %s1929_s21  ;;  %s31_s18 = int_to_ptr.vmem [resolvable:$true] %s30_s18 }
   0x4   :  { %p1933_p1 = scmp.lt.u32.totalorder %s1929_s21, %s2427_s3 }
   0x6   :  { %p1935_p2 = pnand %p1933_p1, %p1930_p0 }
   0x8   :  { %1938 = shalt.err (!%p1935_p2)
}
   0x9   :  { %s1939_s26 = scalar_lea.vmem %s31_s18, 3840  ;;  %p1944_p4 = scmp.lt.s32.totalorder %s31_s18, %s31_s18 }
   0xa   :  { %p1940_p3 = scmp.ne.s32.totalorder %s31_s18, %s1939_s26  ;;  %p1945_p5 = scmp.lt.s32.totalorder %s1939_s26, %s1939_s26 }
   0xc   :  { %p1946_p6 = por %p1945_p5, %p1944_p4 }
   0xe   :  { %p1947_p7 = pnand %p1946_p6, %p1940_p3 }
  0x10   :  { %1950 = shalt.err (!%p1947_p7)
}
  0x11   :  { %s2002_s27 = smov 128   ;;  %s2003_s28 = smov 8  }
  0x12   :  { %36 = dma.hbm_to_vmem [thread:$0]  %s2427_s3, 3840, %s31_s18, [#allocation6], %s2002_s27, %s2002_s27, %s2003_s28  }
  0x13   :  { %s2004_s12 = smov [#allocation8]   ;;  %s1951_s16 = scalar_lea.hbm %s2429_s5, 4096 }
  0x14   :  { %s44_s13 = sshll.u32 %s2004_s12, 4  ;;  %p1952_p8 = scmp.ne.s32.totalorder %s2429_s5, %s1951_s16  ;;  %s45_s13 = int_to_ptr.vmem [resolvable:$true] %s44_s13 }
  0x15   :  { %p1955_p9 = scmp.lt.u32.totalorder %s1951_s16, %s2429_s5 }
  0x17   :  { %p1957_p10 = pnand %p1955_p9, %p1952_p8 }
  0x19   :  { %1960 = shalt.err (!%p1957_p10)
}
  0x1a   :  { %s1961_s22 = scalar_lea.vmem %s45_s13, 4096  ;;  %p1966_p12 = scmp.lt.s32.totalorder %s45_s13, %s45_s13 }
  0x1b   :  { %p1962_p11 = scmp.ne.s32.totalorder %s45_s13, %s1961_s22  ;;  %p1967_p13 = scmp.lt.s32.totalorder %s1961_s22, %s1961_s22 }
  0x1d   :  { %p1968_p0 = por %p1967_p13, %p1966_p12 }
  0x1f   :  { %p1969_p1 = pnand %p1968_p0, %p1962_p11 }
  0x21   :  { %1972 = shalt.err (!%p1969_p1)
}
  0x22   :  { %50 = dma.hbm_to_vmem [thread:$0]  %s2429_s5, 4096, %s45_s13, [#allocation9], %s2002_s27, %s2002_s27, %s2003_s28  }
  0x23   :  { %1995 = dma.done.wait [#allocation6], 3840  }
  0x24   :  { %1996 = vsyncadd [#allocation6], 4294963456 }
  0x25   :  { %1997 = dma.done.wait [#allocation9], 4096  }
  0x26   :  { %1998 = vsyncadd [#allocation9], 4294963200  ;;  %v2005_v0 = vmov 0.0   ;;  %v1424_v1 = vld [vmem:[%s2425_s1 + $0x78] sm:$0xff]  ;;  %v1426_v2 = vld [vmem:[%s2425_s1 + $0x88] sm:$0xff]  ;;  %vm117_vm0 = vcmask 1045504  }
  0x27   :  { %188 = vmatprep.mubr.f32.mxu0 %v2005_v0  ;;  %v1423_v3 = vld [vmem:[%s2425_s1 + $0x70] sm:$0xff]  ;;  %v1734_v4 = vpack.c.bf16 %v1426_v2, %v1424_v1  ;;  %v1425_v5 = vld [vmem:[%s2425_s1 + $0x80] sm:$0xff]  ;;  %v1428_v6 = vld [vmem:[%s2425_s1 + $0x98] sm:$0xff]  ;;  %vm104_vm1 = vcmask 441344   ;;  %vm519_vm2 = vcmask 654336   ;;  %vm534_vm3 = vcmask 648192  }
  0x28   :  { %v1430_v7 = vld [vmem:[%s2425_s1 + $0xa8] sm:$0xff]  ;;  %v1736_v8 = vpack.c.bf16 %v1425_v5, %v1423_v3  ;;  %v1427_v10 = vld [vmem:[%s2425_s1 + $0x90] sm:$0xff]  ;;  %v1429_v11 = vld [vmem:[%s2425_s1 + $0xa0] sm:$0xff]  ;;  %533 = vst.msk [vmem:[#allocation3] sm:$0xff] %vm519_vm2, %v2005_v0  ;;  %vm506_vm4 = vcmask 392192   ;;  %vm2008_vm5 = vmmov 0  }
  0x29   :  { %v1738_v9 = vpack.c.bf16 %v1430_v7, %v1428_v6  ;;  %v1432_v12 = vld [vmem:[%s2425_s1 + $0xb8] sm:$0xff]  ;;  %1735 = vmatprep.subr.bf16.mxu0 %v1734_v4  ;;  %v1434_v13 = vld [vmem:[%s2425_s1 + $0xc8] sm:$0xff]  ;;  %v1740_v14 = vpack.c.bf16 %v1429_v11, %v1427_v10  ;;  %v1431_v16 = vld [vmem:[%s2425_s1 + $0xb0] sm:$0xff]  ;;  %v456_v10 = vlaneseq  ;;  %536 = vst.msk [vmem:[#allocation3 + $0x10] sm:$0xff] %vm519_vm2, %v2005_v0  ;;  %s2009_s30 = smov 64   ;;  %vm844_vm6 = vcmask 523264  }
  0x2a   :  { %1737 = vmatpush1.bf16.msra.mxu0 %v1736_v8  ;;  %v1742_v15 = vpack.c.bf16 %v1434_v13, %v1432_v12  ;;  %v1433_v17 = vld [vmem:[%s2425_s1 + $0xc0] sm:$0xff]  ;;  %v1436_v19 = vld [vmem:[%s2425_s1 + $0xd8] sm:$0x3f]  ;;  %v72_v20 = vld [vmem:[%s2425_s1 + $0x8] sm:$0xff]  ;;  %535 = vst.msk [vmem:[#allocation3 + $0x8] sm:$0x3] %vm534_vm3, %v2005_v0 }
  0x2b   :  { %1739 = vmatprep.subr.bf16.mxu0 %v1738_v9  ;;  %v1744_v18 = vpack.c.bf16 %v1433_v17, %v1431_v16  ;;  %v74_v21 = vld [vmem:[%s2425_s1 + $0x18] sm:$0xff]  ;;  %v71_v22 = vld [vmem:[%s2425_s1] sm:$0xff]  ;;  %v73_v23 = vld [vmem:[%s2425_s1 + $0x10] sm:$0xff]  ;;  %v457_v11 = vshrl.u32 %v456_v10, 7  ;;  %537 = vst.msk [vmem:[#allocation3 + $0x18] sm:$0x3] %vm534_vm3, %v2005_v0 }
  0x2c   :  { %v76_v24 = vld [vmem:[%s2425_s1 + $0x28] sm:$0xff]  ;;  %v78_v25 = vld [vmem:[%s2425_s1 + $0x38] sm:$0xff]  ;;  %v1435_v26 = vld [vmem:[%s2425_s1 + $0xd0] sm:$0x3f]  ;;  %v1746_v27 = vpack.c.bf16 %v74_v21, %v72_v20  ;;  %v1748_v29 = vpack.c.bf16 %v73_v23, %v71_v22  ;;  %vm1215_vm7 = vcmask 261120   ;;  %vm1388_vm8 = vcmask 115792  }
  0x2d   :  { %v85_v28 = vld [vmem:[%s2424_s0 + $0x1] sm:$0xff]  ;;  %v1750_v30 = vpack.c.bf16 %v78_v25, %v76_v24  ;;  %v77_v32 = vld [vmem:[%s2425_s1 + $0x30] sm:$0xff]  ;;  %v82_v34 = vld [vmem:[%s2425_s1 + $0x58] sm:$0xff]  ;;  %v458_v12 = vsub.s32 0, %v457_v11  ;;  %vm1374_vm9 = vcmask 74752   ;;  %vm1399_vm10 = vcmask 33792  }
  0x2e   :  { %1741 = vmatpush1.bf16.msra.mxu0 %v1740_v14  ;;  %v75_v31 = vld [vmem:[%s2425_s1 + $0x20] sm:$0xff]  ;;  %v80_v33 = vld [vmem:[%s2425_s1 + $0x48] sm:$0xff]  ;;  %v81_v39 = vld [vmem:[%s2425_s1 + $0x50] sm:$0xff]  ;;  %v462_v14 = vsub.s32 1, %v457_v11 }
  0x2f   :  { %1743 = vmatprep.subr.bf16.mxu0 %v1742_v15  ;;  %v86_v35 = vld [vmem:[%s2424_s0 + $0x9] sm:$0xff]  ;;  %v1752_v36 = vpack.c.bf16 %v77_v32, %v75_v31  ;;  %v1754_v37 = vpack.c.bf16 %v82_v34, %v80_v33  ;;  %v79_v38 = vld [vmem:[%s2425_s1 + $0x40] sm:$0xff]  ;;  %v1452_v44 = vld [vmem:[%s2425_s1 + $0xf8] sm:$0xff] }
  0x30   :  { %v87_v40 = vld [vmem:[%s2424_s0 + $0x19] sm:$0xff]  ;;  %v1756_v41 = vpack.c.bf16 %v81_v39, %v79_v38  ;;  %v84_v42 = vld [vmem:[%s2425_s1 + $0x68] sm:$0x3f]  ;;  %v1451_v49 = vld [vmem:[%s2425_s1 + $0xf0] sm:$0xff] }
  0x31   :  { %v1450_v43 = vld [vmem:[%s2425_s1 + $0xe8] sm:$0xff]  ;;  %v83_v46 = vld [vmem:[%s2425_s1 + $0x60] sm:$0x3f]  ;;  %v1456_v51 = vld [vmem:[%s2425_s1 + $0x118] sm:$0xff] }
  0x32   :  { %1745 = vmatpush1.bf16.msra.mxu0 %v1744_v18  ;;  %v88_v45 = vld [vmem:[%s2424_s0 + $0x21] sm:$0xff]  ;;  %v1758_v47 = vpack.c.bf16 %v1452_v44, %v1450_v43  ;;  %v1455_v56 = vld [vmem:[%s2425_s1 + $0x110] sm:$0xff]  ;;  %v1460_v58 = vld [vmem:[%s2425_s1 + $0x138] sm:$0xff] }
  0x33   :  { %1437 = vmatprep.subr.msk.mxu0 %vm117_vm0, %v1436_v19  ;;  %v1449_v48 = vld [vmem:[%s2425_s1 + $0xe0] sm:$0xff]  ;;  %v1454_v50 = vld [vmem:[%s2425_s1 + $0x108] sm:$0xff]  ;;  %v1459_v63 = vld [vmem:[%s2425_s1 + $0x130] sm:$0xff] }
  0x34   :  { %v67_v52 = vld [vmem:[%s2424_s0] sm:$0xff]  ;;  %v1760_v53 = vpack.c.bf16 %v1451_v49, %v1449_v48  ;;  %v1762_v54 = vpack.c.bf16 %v1456_v51, %v1454_v50  ;;  %v1458_v57 = vld [vmem:[%s2425_s1 + $0x128] sm:$0xff]  ;;  %v69_v1 = vld [vmem:[%s2424_s0 + $0x18] sm:$0xff] }
  0x35   :  { %v1453_v55 = vld [vmem:[%s2425_s1 + $0x100] sm:$0xff]  ;;  %v68_v59 = vld [vmem:[%s2424_s0 + $0x8] sm:$0xff]  ;;  %v1766_v61 = vpack.c.bf16 %v1460_v58, %v1458_v57  ;;  %v557_v34 = vld [vmem:[#allocation5 + $0x60] sm:$0xff] }
  0x36   :  { %1438 = vmatpush1.msk.msra.mxu0 %vm117_vm0, %v1435_v26  ;;  %v1764_v60 = vpack.c.bf16 %v1455_v56, %v1453_v55  ;;  %v1457_v62 = vld [vmem:[%s2425_s1 + $0x120] sm:$0xff]  ;;  %v1462_v3 = vld [vmem:[%s2425_s1 + $0x148] sm:$0x3f]  ;;  %v561_v49 = vld [vmem:[#allocation5 + $0x80] sm:$0xff] }
  0x37   :  { %1439 = vmatmul.mubr.msk.f32.vlgmr.msra.gmra.mrb[0].mxu0 %vm104_vm1, %v85_v28  ;;  %1747 = vmatprep.subr.bf16.mxu0 %v1746_v27  ;;  %v1768_v2 = vpack.c.bf16 %v1459_v63, %v1457_v62  ;;  %v70_v4 = vld [vmem:[%s2424_s0 + $0x20] sm:$0xff]  ;;  %v321_v7 = vld [vmem:[%s2424_s0 + $0xa] sm:$0xff]  ;;  %v562_v50 = vld [vmem:[#allocation5 + $0x88] sm:$0xff] }
  0x38   :  { %1749 = vmatpush1.bf16.msra.mxu0 %v1748_v29  ;;  %194 = vmatprep.mubr.f32.mxu0 %v2005_v0  ;;  %v1461_v5 = vld [vmem:[%s2425_s1 + $0x140] sm:$0x3f]  ;;  %v556_v26 = vld [vmem:[#allocation5 + $0x58] sm:$0xff]  ;;  %v1782_v51 = vpack.c.bf16 %v562_v50, %v561_v49  ;;  %v542_v55 = vld [vmem:[#allocation5] sm:$0xff] }
  0x39   :  { %1751 = vmatprep.subr.bf16.mxu0 %v1750_v30  ;;  %v320_v6 = vld [vmem:[%s2424_s0 + $0x2] sm:$0xff]  ;;  %v322_v8 = vld [vmem:[%s2424_s0 + $0x1a] sm:$0xff] }
  0x3a   :  { %v323_v9 = vld [vmem:[%s2424_s0 + $0x22] sm:$0xff]  ;;  %v454_v13 = vld [vmem:[%s2426_s2] sm:$0x3]  ;;  %s2006_s0 = smov 48   ;;  %v543_v57 = vld [vmem:[#allocation5 + $0x8] sm:$0xff] }
  0x3b   :  { %1440 = vmatmul.mubr.msk.f32.gmra.mrb[2].mxu0 %vm104_vm1, %v86_v35  ;;  %v459_v15 = vrot.slane %v454_v13, %v458_v12  ;;  %v463_v16 = vrot.slane %v454_v13, %v462_v14  ;;  %v555_v25 = vld [vmem:[#allocation5 + $0x50] sm:$0xff]  ;;  %v558_v35 = vld [vmem:[#allocation5 + $0x68] sm:$0xff]  ;;  %v560_v44 = vld [vmem:[#allocation5 + $0x78] sm:$0xff]  ;;  %v1790_v58 = vpack.c.bf16 %v543_v57, %v542_v55 }
  0x3c   :  { %1753 = vmatpush1.bf16.msra.mxu0 %v1752_v36  ;;  %200 = vmatprep.mubr.f32.mxu0 %v2005_v0  ;;  %v1770_v27 = vpack.c.bf16 %v556_v26, %v555_v25  ;;  %v1774_v36 = vpack.c.bf16 %v558_v35, %v557_v34  ;;  %v559_v43 = vld [vmem:[#allocation5 + $0x70] sm:$0xff]  ;;  %v731_v34 = vld [vmem:[#allocation5 + $0xa8] sm:$0xff] }
  0x3d   :  { %1755 = vmatprep.subr.bf16.mxu0 %v1754_v37 }
  0x3e   :  { %1771 = vmatprep.subr.bf16.mxu1 %v1770_v27 }
  0x3f   :  { %1441 = vmatmul.mubr.msk.f32.gmra.mrb[4].mxu0 %vm104_vm1, %v87_v40  ;;  %1773 = vmatpush3.bf16.msra.mxu1 %v1770_v27  ;;  %v548_v27 = vld [vmem:[#allocation5 + $0x30] sm:$0xff] }
  0x40   :  { %1757 = vmatpush1.bf16.msra.mxu0 %v1756_v41  ;;  %206 = vmatprep.mubr.f32.mxu0 %v2005_v0 }
  0x41   :  { %1443 = vmatprep.subr.msk.mxu0 %vm117_vm0, %v84_v42  ;;  %1775 = vmatprep.subr.bf16.mxu1 %v1774_v36 }
  0x43   :  { %1442 = vmatmul.mubr.msk.f32.gmra.mrb[6].mxu0 %vm104_vm1, %v88_v45  ;;  %1777 = vmatpush3.bf16.msra.mxu1 %v1774_v36  ;;  %v1778_v45 = vpack.c.bf16 %v560_v44, %v559_v43  ;;  %v732_v36 = vld [vmem:[#allocation5 + $0xb0] sm:$0xff] }
  0x44   :  { %1444 = vmatpush1.msk.msra.mxu0 %vm117_vm0, %v83_v46  ;;  %295 = vmatprep.mubr.f32.mxu0 %v2005_v0  ;;  %v736_v44 = vld [vmem:[#allocation5 + $0xd0] sm:$0xff] }
  0x45   :  { %1759 = vmatprep.subr.bf16.mxu0 %v1758_v47  ;;  %1779 = vmatprep.subr.bf16.mxu1 %v1778_v45 }
  0x47   :  { %1445 = vmatmul.mubr.msk.f32.vlgmr.msra.gmra.mrb[0].mxu0 %vm104_vm1, %v67_v52  ;;  %1781 = vmatpush3.bf16.msra.mxu1 %v1778_v45  ;;  %v737_v45 = vld [vmem:[#allocation5 + $0xd8] sm:$0xff] }
  0x48   :  { %1761 = vmatpush1.bf16.msra.mxu0 %v1760_v53  ;;  %301 = vmatprep.mubr.f32.mxu0 %v2005_v0  ;;  %v563_v53 = vld [vmem:[#allocation5 + $0x90] sm:$0xff] }
  0x49   :  { %1763 = vmatprep.subr.bf16.mxu0 %v1762_v54  ;;  %1783 = vmatprep.subr.bf16.mxu1 %v1782_v51  ;;  %v564_v54 = vld [vmem:[#allocation5 + $0x98] sm:$0xff] }
  0x4a   :  { %v1786_v56 = vpack.c.bf16 %v564_v54, %v563_v53  ;;  %v851_v53 = vld [vmem:[#allocation8] sm:$0xff]  ;;  %v2007_v54 = vmov 0.0|0.0  }
  0x4b   :  { %1446 = vmatmul.mubr.msk.f32.gmra.mrb[2].mxu0 %vm104_vm1, %v68_v59  ;;  %1785 = vmatpush3.bf16.msra.mxu1 %v1782_v51  ;;  %v865_v51 = vld [vmem:[#allocation8 + $0x40] sm:$0xff] }
  0x4c   :  { %1765 = vmatpush1.bf16.msra.mxu0 %v1764_v60  ;;  %307 = vmatprep.mubr.f32.mxu0 %v2005_v0 }
  0x4d   :  { %1767 = vmatprep.subr.bf16.mxu0 %v1766_v61  ;;  %1787 = vmatprep.subr.bf16.mxu1 %v1786_v56 }
  0x4f   :  { %1447 = vmatmul.mubr.msk.f32.gmra.mrb[4].mxu0 %vm104_vm1, %v69_v1  ;;  %1789 = vmatpush3.bf16.msra.mxu1 %v1786_v56  ;;  %v852_v56 = vld [vmem:[#allocation8 + $0x8] sm:$0xff] }
  0x50   :  { %1769 = vmatpush1.bf16.msra.mxu0 %v1768_v2  ;;  %313 = vmatprep.mubr.f32.mxu0 %v2005_v0  ;;  %v1843_v57 = vpack.c.bf16 %v852_v56, %v851_v53 }
  0x51   :  { %1463 = vmatprep.subr.msk.mxu0 %vm117_vm0, %v1462_v3  ;;  %1791 = vmatprep.subr.bf16.mxu1 %v1790_v58 }
  0x53   :  { %1448 = vmatmul.mubr.msk.f32.gmra.mrb[6].mxu0 %vm104_vm1, %v70_v4 }
  0x54   :  { %1464 = vmatpush1.msk.msra.mxu0 %vm117_vm0, %v1461_v5  ;;  %421 = vmatprep.mubr.f32.mxu0 %v2005_v0 }
  0x55   :  { %1830 = vmatprep.subr.bf16.mxu0 %v2007_v54 }
  0x57   :  { %1465 = vmatmul.mubr.msk.f32.vlgmr.msra.gmra.mrb[0].mxu0 %vm104_vm1, %v320_v6 }
  0x58   :  { %427 = vmatprep.mubr.f32.mxu0 %v2005_v0 }
  0x5b   :  { %1466 = vmatmul.mubr.msk.f32.gmra.mrb[2].mxu0 %vm104_vm1, %v321_v7 }
  0x5c   :  { %433 = vmatprep.mubr.f32.mxu0 %v2005_v0 }
  0x5f   :  { %1467 = vmatmul.mubr.msk.f32.gmra.mrb[4].mxu0 %vm104_vm1, %v322_v8 }
  0x60   :  { %439 = vmatprep.mubr.f32.mxu0 %v2005_v0 }
  0x63   :  { %1468 = vmatmul.mubr.msk.f32.gmra.mrb[6].mxu0 %vm104_vm1, %v323_v9 }
  0x64   :  { %1652 = vmatprep.mubr.msk.f32.mxu0 %vm2008_vm5, %v2005_v0 }
 0x12a   :  { %v423_v17 = vpop.f32.mrb[0].mxu0 }
 0x12b   :  { %v2295_v18 = vadd.f32 %v459_v15, %v423_v17  ;;  %v425_v19 = vpop.f32.mrb[1].mxu0 }
 0x12c   :  { %v467_v21 = vadd.f32 %v463_v16, %v425_v19  ;;  %v544_v19 = vld [vmem:[#allocation5 + $0x10] sm:$0xff] }
 0x12d   :  { %v474_v20 = vmax.f32 %v2295_v18, 0.0 }
 0x12e   :  { %v429_v22 = vpop.f32.mrb[2].mxu0  ;;  %v475_v28 = vmax.f32 %v467_v21, 0.0 }
 0x12f   :  { %v2298_v23 = vadd.f32 %v459_v15, %v429_v22  ;;  %490 = vrot.lane.b32.xlu0 %v474_v20, %s2006_s0  ;;  %v431_v24 = vpop.f32.mrb[3].mxu0 }
 0x130   :  { %v469_v30 = vadd.f32 %v463_v16, %v431_v24  ;;  %v547_v24 = vld [vmem:[#allocation5 + $0x28] sm:$0xff] }
 0x131   :  { %v476_v29 = vmax.f32 %v2298_v23, 0.0  ;;  %v546_v23 = vld [vmem:[#allocation5 + $0x20] sm:$0xff] }
 0x132   :  { %v435_v31 = vpop.f32.mrb[4].mxu0  ;;  %v477_v37 = vmax.f32 %v469_v30, 0.0  ;;  %v1798_v26 = vpack.c.bf16 %v547_v24, %v546_v23  ;;  %v550_v30 = vld [vmem:[#allocation5 + $0x40] sm:$0xff]  ;;  %v1025_v24 = vld [vmem:[#allocation8 + $0x80] sm:$0xff] }
 0x133   :  { %v470_v32 = vadd.f32 %v459_v15, %v435_v31  ;;  %492 = vrot.lane.b32.xlu0 %v475_v28, %s2006_s0  ;;  %494 = vrot.lane.b32.xlu1 %v476_v29, %s2006_s0  ;;  %v437_v33 = vpop.f32.mrb[5].mxu0  ;;  %v549_v28 = vld [vmem:[#allocation5 + $0x38] sm:$0xff]  ;;  %v551_v31 = vld [vmem:[#allocation5 + $0x48] sm:$0xff] }
 0x134   :  { %v471_v39 = vadd.f32 %v463_v16, %v437_v33  ;;  %v730_v33 = vld [vmem:[#allocation5 + $0xa0] sm:$0xff] }
 0x135   :  { %v478_v38 = vmax.f32 %v470_v32, 0.0  ;;  %v1806_v32 = vpack.c.bf16 %v551_v31, %v550_v30  ;;  %v1810_v35 = vpack.c.bf16 %v731_v34, %v730_v33 }
 0x136   :  { %v441_v40 = vpop.f32.mrb[6].mxu0  ;;  %v479_v46 = vmax.f32 %v471_v39, 0.0 }
 0x137   :  { %v472_v41 = vadd.f32 %v459_v15, %v441_v40  ;;  %496 = vrot.lane.b32.xlu1 %v477_v37, %s2006_s0  ;;  %498 = vrot.lane.b32.xlu0 %v478_v38, %s2006_s0  ;;  %v443_v42 = vpop.f32.mrb[7].mxu0  ;;  %v733_v37 = vld [vmem:[#allocation5 + $0xb8] sm:$0xff]  ;;  %v734_v40 = vld [vmem:[#allocation5 + $0xc0] sm:$0xff] }
 0x138   :  { %v473_v48 = vadd.f32 %v463_v16, %v443_v42 }
 0x139   :  { %v480_v47 = vmax.f32 %v472_v41, 0.0  ;;  %v735_v41 = vld [vmem:[#allocation5 + $0xc8] sm:$0xff] }
 0x13a   :  { %v481_v52 = vmax.f32 %v473_v48, 0.0  ;;  %v1818_v43 = vpack.c.bf16 %v735_v41, %v734_v40  ;;  %v739_v48 = vld [vmem:[#allocation5 + $0xe8] sm:$0xff] }
 0x13b   :  { %500 = vrot.lane.b32.xlu1 %v479_v46, %s2006_s0  ;;  %502 = vrot.lane.b32.xlu0 %v480_v47, %s2006_s0  ;;  %v1822_v46 = vpack.c.bf16 %v737_v45, %v736_v44  ;;  %v1117_v44 = vld [vmem:[#allocation8 + $0xe0] sm:$0xff]  ;;  %v1118_v45 = vld [vmem:[#allocation8 + $0xe8] sm:$0xff] }
 0x13f   :  { %504 = vrot.lane.b32.xlu1 %v481_v52, %s2006_s0  ;;  %v866_v52 = vld [vmem:[#allocation8 + $0x48] sm:$0xff] }
 0x140   :  { %v1831_v55 = vpack.c.bf16 %v866_v52, %v865_v51  ;;  %v1120_v51 = vld [vmem:[#allocation8 + $0xf8] sm:$0xff] }
 0x142   :  { %1832 = vmatpush3.bf16.msra.mxu0 %v1831_v55 }
 0x143   :  { %1833 = vmatprep.subr.bf16.mxu0 %v2007_v54 }
 0x1a1   :  { %v491_v59 = vpop.permute.xlu0 %490 }
 0x1a5   :  { %v493_v60 = vpop.permute.xlu0 %492  ;;  %v495_v61 = vpop.permute.xlu1 %494 }
 0x1a6   :  { %v507_v62 = vsel %vm506_vm4, %v491_v59, %v493_v60  ;;  %v868_v59 = vld [vmem:[#allocation8 + $0x58] sm:$0xff]  ;;  %v853_v60 = vld [vmem:[#allocation8 + $0x10] sm:$0xff] }
 0x1a7   :  { %v515_v63 = vmax.f32 %v474_v20, %v507_v62  ;;  %v545_v20 = vld [vmem:[#allocation5 + $0x18] sm:$0xff]  ;;  %v854_v62 = vld [vmem:[#allocation8 + $0x18] sm:$0xff] }
 0x1a8   :  { %v1794_v21 = vpack.c.bf16 %v545_v20, %v544_v19 }
 0x1a9   :  { %520 = vst.msk [vmem:[#allocation2] sm:$0xff] %vm519_vm2, %v515_v63  ;;  %v497_v1 = vpop.permute.xlu1 %496  ;;  %v499_v4 = vpop.permute.xlu0 %498  ;;  %v1846_v63 = vpack.c.bf16 %v854_v62, %v853_v60  ;;  %v1205_v62 = vld [vmem:[%s2431_s7 + $0x8] sm:$0xff] }
 0x1aa   :  { %v508_v2 = vsel %vm506_vm4, %v495_v61, %v497_v1  ;;  %v869_v1 = vld [vmem:[#allocation8 + $0x60] sm:$0xff] }
 0x1ab   :  { %v516_v3 = vmax.f32 %v476_v29, %v508_v2  ;;  %v1802_v29 = vpack.c.bf16 %v549_v28, %v548_v27  ;;  %v870_v2 = vld [vmem:[#allocation8 + $0x68] sm:$0xff]  ;;  %v1027_v28 = vld [vmem:[#allocation8 + $0x90] sm:$0xff] }
 0x1ac   :  { %v1114_v27 = vld [vmem:[#allocation8 + $0xc8] sm:$0xff] }
 0x1ad   :  { %521 = vst.msk [vmem:[#allocation2 + $0x8] sm:$0xff] %vm519_vm2, %v516_v3  ;;  %v501_v5 = vpop.permute.xlu1 %500  ;;  %v503_v8 = vpop.permute.xlu0 %502  ;;  %v855_v3 = vld [vmem:[#allocation8 + $0x20] sm:$0xff] }
 0x1ae   :  { %v509_v6 = vsel %vm506_vm4, %v499_v4, %v501_v5  ;;  %v1837_v4 = vpack.c.bf16 %v870_v2, %v869_v1  ;;  %v856_v5 = vld [vmem:[#allocation8 + $0x28] sm:$0xff]  ;;  %v1206_v1 = vld [vmem:[%s2431_s7 + $0x10] sm:$0xff]  ;;  %v1207_v2 = vld [vmem:[%s2431_s7 + $0x18] sm:$0xff] }
 0x1af   :  { %v517_v7 = vmax.f32 %v478_v38, %v509_v6  ;;  %v1814_v38 = vpack.c.bf16 %v733_v37, %v732_v36  ;;  %v871_v6 = vld [vmem:[#allocation8 + $0x70] sm:$0xff] }
 0x1b1   :  { %522 = vst.msk [vmem:[#allocation2 + $0x10] sm:$0xff] %vm519_vm2, %v517_v7  ;;  %v505_v9 = vpop.permute.xlu1 %504  ;;  %v872_v7 = vld [vmem:[#allocation8 + $0x78] sm:$0xff] }
 0x1b2   :  { %v510_v10 = vsel %vm506_vm4, %v503_v8, %v505_v9  ;;  %v1849_v8 = vpack.c.bf16 %v856_v5, %v855_v3  ;;  %v857_v9 = vld [vmem:[#allocation8 + $0x30] sm:$0xff]  ;;  %v1882_v3 = vpack.c.bf16 %v1207_v2, %v1206_v1 }
 0x1b3   :  { %v518_v11 = vmax.f32 %v480_v47, %v510_v10  ;;  %v738_v47 = vld [vmem:[#allocation5 + $0xe0] sm:$0xff]  ;;  %v858_v10 = vld [vmem:[#allocation8 + $0x38] sm:$0xff] }
 0x1b4   :  { %v524_v12 = vld [vmem:[#allocation2] ss:$2 sm:$0xff]  ;;  %v528_v13 = vld [vmem:[#allocation2 + $0x1] ss:$2 sm:$0xff]  ;;  %v1826_v49 = vpack.c.bf16 %v739_v48, %v738_v47  ;;  %v1873_v47 = vpack.c.bf16 %v1118_v45, %v1117_v44  ;;  %v1031_v48 = vld [vmem:[#allocation8 + $0xb0] sm:$0xff] }
 0x1b5   :  { %v531_v14 = vmax.f32 %v524_v12, %v528_v13  ;;  %523 = vst.msk [vmem:[#allocation2 + $0x18] sm:$0xff] %vm519_vm2, %v518_v11  ;;  %v1840_v11 = vpack.c.bf16 %v872_v7, %v871_v6  ;;  %v1475_v12 = vld [vmem:[%s2428_s4] ss:$0 sm:$0xff]  ;;  %v1852_v13 = vpack.c.bf16 %v858_v10, %v857_v9 }
 0x1b7   :  { %538 = vst.msk [vmem:[#allocation3 + $0x1] sm:$0xff] %vm519_vm2, %v531_v14 }
 0x1bc   :  { %v526_v15 = vld [vmem:[#allocation2 + $0x10] ss:$2 sm:$0xff]  ;;  %v530_v16 = vld [vmem:[#allocation2 + $0x11] ss:$2 sm:$0xff] }
 0x1bd   :  { %v532_v17 = vmax.f32 %v526_v15, %v530_v16 }
 0x1be   :  { %v552_v18 = vld [vmem:[#allocation3 + $0x1] sm:$0xff] }
 0x1bf   :  { %1587 = vmatprep.mubr.msk.f32.mxu1 %vm519_vm2, %v552_v18  ;;  %539 = vst.msk [vmem:[#allocation3 + $0x11] sm:$0xff] %vm519_vm2, %v532_v17  ;;  %v540_v25 = vld [vmem:[#allocation3] sm:$0xff] }
 0x1c0   :  { %v727_v42 = vld [vmem:[#allocation3 + $0x2] sm:$0xff] }
 0x1c6   :  { %v553_v22 = vld [vmem:[#allocation3 + $0x11] sm:$0xff] }
 0x1c7   :  { %1588 = vmatmul.mubr.msk.f32.vlgmr.msra.gmra.mrb[0].mxu1 %vm519_vm2, %v553_v22  ;;  %v541_v39 = vld [vmem:[#allocation3 + $0x10] sm:$0xff] }
 0x1c8   :  { %1793 = vmatpush3.bf16.msra.mxu1 %v1790_v58  ;;  %1610 = vmatprep.mubr.msk.f32.mxu1 %vm519_vm2, %v540_v25  ;;  %v728_v50 = vld [vmem:[#allocation3 + $0x12] sm:$0xff]  ;;  %v1026_v25 = vld [vmem:[#allocation8 + $0x88] sm:$0xff] }
 0x1c9   :  { %1795 = vmatprep.subr.bf16.mxu1 %v1794_v21  ;;  %v867_v58 = vld [vmem:[#allocation8 + $0x50] sm:$0xff] }
 0x1ca   :  { %v1834_v61 = vpack.c.bf16 %v868_v59, %v867_v58 }
 0x1cc   :  { %1797 = vmatpush3.bf16.msra.mxu1 %v1794_v21  ;;  %1835 = vmatpush3.bf16.msra.mxu0 %v1834_v61  ;;  %v1204_v61 = vld [vmem:[%s2431_s7] sm:$0xff] }
 0x1cd   :  { %1799 = vmatprep.subr.bf16.mxu1 %v1798_v26  ;;  %1836 = vmatprep.subr.bf16.mxu0 %v2007_v54 }
 0x1d0   :  { %1801 = vmatpush3.bf16.msra.mxu1 %v1798_v26  ;;  %1838 = vmatpush3.bf16.msra.mxu0 %v1837_v4  ;;  %v1113_v26 = vld [vmem:[#allocation8 + $0xc0] sm:$0xff] }
 0x1d1   :  { %1803 = vmatprep.subr.bf16.mxu1 %v1802_v29  ;;  %1839 = vmatprep.subr.bf16.mxu0 %v2007_v54  ;;  %v1867_v36 = vpack.c.bf16 %v1114_v27, %v1113_v26 }
 0x1d4   :  { %1805 = vmatpush3.bf16.msra.mxu1 %v1802_v29  ;;  %1841 = vmatpush3.bf16.msra.mxu0 %v1840_v11  ;;  %v1028_v29 = vld [vmem:[#allocation8 + $0x98] sm:$0xff] }
 0x1d5   :  { %1807 = vmatprep.subr.bf16.mxu1 %v1806_v32  ;;  %1854 = vmatprep.subr.bf16.mxu0 %v2007_v54  ;;  %v1858_v40 = vpack.c.bf16 %v1028_v29, %v1027_v28 }
 0x1d8   :  { %1809 = vmatpush3.bf16.msra.mxu1 %v1806_v32  ;;  %v1855_v32 = vpack.c.bf16 %v1026_v25, %v1025_v24  ;;  %v1481_v24 = vld [vmem:[%s2432_s8] ss:$0 sm:$0xff]  ;;  %s2010_s8 = smov 118  }
 0x1d9   :  { %1811 = vmatprep.subr.bf16.mxu1 %v1810_v35 }
 0x1db   :  { %1611 = vmatmul.mubr.msk.f32.vlgmr.msra.gmra.mrb[0].mxu1 %vm519_vm2, %v541_v39  ;;  %v1116_v39 = vld [vmem:[#allocation8 + $0xd8] sm:$0xff] }
 0x1dc   :  { %1813 = vmatpush3.bf16.msra.mxu1 %v1810_v35  ;;  %1633 = vmatprep.mubr.msk.f32.mxu1 %vm519_vm2, %v727_v42  ;;  %v1029_v42 = vld [vmem:[#allocation8 + $0xa0] sm:$0xff] }
 0x1dd   :  { %1815 = vmatprep.subr.bf16.mxu1 %v1814_v38 }
 0x1e0   :  { %1817 = vmatpush3.bf16.msra.mxu1 %v1814_v38  ;;  %v1115_v38 = vld [vmem:[#allocation8 + $0xd0] sm:$0xff] }
 0x1e1   :  { %1819 = vmatprep.subr.bf16.mxu1 %v1818_v43  ;;  %v1870_v41 = vpack.c.bf16 %v1116_v39, %v1115_v38 }
 0x1e4   :  { %1821 = vmatpush3.bf16.msra.mxu1 %v1818_v43  ;;  %v1030_v43 = vld [vmem:[#allocation8 + $0xa8] sm:$0xff] }
 0x1e5   :  { %1823 = vmatprep.subr.bf16.mxu1 %v1822_v46 }
 0x1e8   :  { %1825 = vmatpush3.bf16.msra.mxu1 %v1822_v46  ;;  %v1861_v46 = vpack.c.bf16 %v1030_v43, %v1029_v42 }
 0x1e9   :  { %1827 = vmatprep.subr.bf16.mxu1 %v1826_v49 }
 0x1ec   :  { %1829 = vmatpush3.bf16.msra.mxu1 %v1826_v49  ;;  %v1032_v49 = vld [vmem:[#allocation8 + $0xb8] sm:$0xff] }
 0x1ed   :  { %1842 = vmatprep.subr.bf16.mxu1 %v2007_v54  ;;  %v1864_v52 = vpack.c.bf16 %v1032_v49, %v1031_v48 }
 0x1ef   :  { %1634 = vmatmul.mubr.msk.f32.vlgmr.msra.gmra.mrb[0].mxu1 %vm519_vm2, %v728_v50  ;;  %v1119_v50 = vld [vmem:[#allocation8 + $0xf0] sm:$0xff] }
 0x1f0   :  { %1844 = vmatpush3.bf16.msra.mxu1 %v1843_v57  ;;  %1671 = vmatprep.mubr.msk.f32.mxu1 %vm2008_vm5, %v2005_v0  ;;  %v1876_v53 = vpack.c.bf16 %v1120_v51, %v1119_v50 }
 0x1f1   :  { %1845 = vmatprep.subr.bf16.mxu1 %v2007_v54 }
 0x1f4   :  { %1847 = vmatpush3.bf16.msra.mxu1 %v1846_v63  ;;  %v1879_v63 = vpack.c.bf16 %v1205_v62, %v1204_v61 }
 0x1f5   :  { %1848 = vmatprep.subr.bf16.mxu1 %v2007_v54 }
 0x1f8   :  { %1850 = vmatpush3.bf16.msra.mxu1 %v1849_v8 }
 0x1f9   :  { %1851 = vmatprep.subr.bf16.mxu1 %v2007_v54 }
 0x1fc   :  { %1853 = vmatpush3.bf16.msra.mxu1 %v1852_v13  ;;  %v1480_v13 = vld [vmem:[%s2430_s6] ss:$0 sm:$0xff] }
 0x1fd   :  { %1866 = vmatprep.subr.bf16.mxu1 %v2007_v54 }
 0x2c2   :  { %v1635_v14 = vpop.f32.mrb[0].mxu1 }
 0x2c3   :  { %v831_v15 = vadd.f32 %v1635_v14, %v1475_v12  ;;  %v812_v16 = vpop.f32.mrb[1].mxu1 }
 0x2c4   :  { %v830_v17 = vadd.f32 %v1475_v12, %v812_v16  ;;  %v1290_v16 = vld [vmem:[%s2433_s9] sm:$0xff] }
 0x2c5   :  { %v833_v18 = vmax.f32 %v831_v15, 0.0 }
 0x2c6   :  { %v832_v19 = vmax.f32 %v830_v17, 0.0  ;;  %v1291_v17 = vld [vmem:[%s2433_s9 + $0x8] sm:$0xff] }
 0x2c7   :  { %838 = vrot.lane.b32.xlu1 %v833_v18, %s2009_s30 }
 0x2c8   :  { %836 = vrot.lane.b32.xlu0 %v832_v19, %s2009_s30 }
 0x339   :  { %v839_v20 = vpop.permute.xlu1 %838 }
 0x33a   :  { %v843_v21 = vmax.f32 %v833_v18, %v839_v20  ;;  %v837_v22 = vpop.permute.xlu0 %836 }
 0x33b   :  { %v842_v23 = vmax.f32 %v832_v19, %v837_v22  ;;  %v1885_v19 = vpack.c.bf16 %v1291_v17, %v1290_v16  ;;  %v1293_v22 = vld [vmem:[%s2433_s9 + $0x18] sm:$0xff] }
 0x33c   :  { %846 = vst.msk [vmem:[#allocation4 + $0x8] sm:$0xff] %vm844_vm6, %v843_v21  ;;  %v1292_v21 = vld [vmem:[%s2433_s9 + $0x10] sm:$0xff]  ;;  %s2011_s9 = smov [#allocation10]  }
 0x33d   :  { %845 = vst.msk [vmem:[#allocation4] sm:$0xff] %vm844_vm6, %v842_v23  ;;  %v1888_v23 = vpack.c.bf16 %v1293_v22, %v1292_v21 }
 0x344   :  { %v860_v30 = vld [vmem:[#allocation4 + $0x2] ss:$8 sm:$0x3]  ;;  %v862_v31 = vld [vmem:[#allocation4 + $0x3] ss:$8 sm:$0x3] }
 0x345   :  { %v863_v33 = vmax.f32 %v860_v30, %v862_v31  ;;  %v847_v34 = vld [vmem:[#allocation4] ss:$8 sm:$0x3]  ;;  %v849_v35 = vld [vmem:[#allocation4 + $0x1] ss:$8 sm:$0x3] }
 0x346   :  { %v850_v37 = vmax.f32 %v847_v34, %v849_v35  ;;  %v1020_v55 = vld [vmem:[#allocation4 + $0x4] ss:$8 sm:$0x3]  ;;  %v1022_v56 = vld [vmem:[#allocation4 + $0x5] ss:$8 sm:$0x3] }
 0x347   :  { %1653 = vmatmul.mubr.msk.f32.vlgmr.msra.gmra.mrb[8].mxu0 %vm844_vm6, %v863_v33  ;;  %v1108_v57 = vld [vmem:[#allocation4 + $0x6] ss:$8 sm:$0x3]  ;;  %v1110_v58 = vld [vmem:[#allocation4 + $0x7] ss:$8 sm:$0x3]  ;;  %v1023_v59 = vmax.f32 %v1020_v55, %v1022_v56 }
 0x348   :  { %1672 = vmatmul.mubr.msk.f32.vlgmr.msra.gmra.mrb[2].mxu1 %vm844_vm6, %v850_v37  ;;  %1856 = vmatpush3.bf16.msra.mxu0 %v1855_v32  ;;  %v1111_v60 = vmax.f32 %v1108_v57, %v1110_v58 }
 0x349   :  { %1868 = vmatpush3.bf16.msra.mxu1 %v1867_v36  ;;  %1857 = vmatprep.subr.bf16.mxu0 %v2007_v54 }
 0x34a   :  { %1869 = vmatprep.subr.bf16.mxu1 %v2007_v54  ;;  %1690 = vmatprep.mubr.msk.f32.mxu0 %vm2008_vm5, %v2005_v0 }
 0x34b   :  { %1709 = vmatprep.mubr.msk.f32.mxu1 %vm2008_vm5, %v2005_v0 }
 0x34c   :  { %1859 = vmatpush3.bf16.msra.mxu0 %v1858_v40 }
 0x34d   :  { %1871 = vmatpush3.bf16.msra.mxu1 %v1870_v41  ;;  %1860 = vmatprep.subr.bf16.mxu0 %v2007_v54 }
 0x34e   :  { %1872 = vmatprep.subr.bf16.mxu1 %v2007_v54 }
 0x350   :  { %1862 = vmatpush3.bf16.msra.mxu0 %v1861_v46 }
 0x351   :  { %1874 = vmatpush3.bf16.msra.mxu1 %v1873_v47  ;;  %1863 = vmatprep.subr.bf16.mxu0 %v2007_v54 }
 0x352   :  { %1875 = vmatprep.subr.bf16.mxu1 %v2007_v54 }
 0x354   :  { %1865 = vmatpush3.bf16.msra.mxu0 %v1864_v52 }
 0x355   :  { %1877 = vmatpush3.bf16.msra.mxu1 %v1876_v53  ;;  %1878 = vmatprep.subr.bf16.mxu0 %v2007_v54 }
 0x357   :  { %1691 = vmatmul.mubr.msk.f32.vlgmr.msra.gmra.mrb[10].mxu0 %vm844_vm6, %v1023_v59 }
 0x358   :  { %1710 = vmatmul.mubr.msk.f32.vlgmr.msra.gmra.mrb[4].mxu1 %vm844_vm6, %v1111_v60  ;;  %1720 = vmatprep.mubr.msk.f32.mxu0 %vm2008_vm5, %v2005_v0 }
 0x359   :  { %1880 = vmatpush3.bf16.msra.mxu0 %v1879_v63 }
 0x35a   :  { %1881 = vmatprep.subr.bf16.mxu0 %v2007_v54 }
 0x35d   :  { %1883 = vmatpush3.bf16.msra.mxu0 %v1882_v3 }
 0x35e   :  { %1884 = vmatprep.subr.bf16.mxu0 %v2007_v54 }
 0x41a   :  { %v942_v4 = vpop.f32.mrb[8].mxu0 }
 0x41b   :  { %v1015_v5 = vpop.f32.mrb[2].mxu1  ;;  %v1654_v6 = vpop.f32.mrb[9].mxu0 }
 0x41c   :  { %v1016_v7 = vadd.f32 %v1015_v5, %v942_v4  ;;  %v1673_v8 = vpop.f32.mrb[3].mxu1 }
 0x42a   :  { %v1102_v9 = vpop.f32.mrb[10].mxu0 }
 0x42b   :  { %v1106_v10 = vadd.f32 %v1102_v9, %v1016_v7  ;;  %v1190_v11 = vpop.f32.mrb[4].mxu1  ;;  %v1692_v12 = vpop.f32.mrb[11].mxu0 }
 0x42c   :  { %v1711_v14 = vpop.f32.mrb[5].mxu1 }
 0x42d   :  { %v1194_v15 = vadd.f32 %v1190_v11, %v1106_v10 }
 0x42f   :  { %v1202_v18 = vadd.f32 %v1480_v13, %v1194_v15 }
 0x431   :  { %v1203_v20 = vmax.f32 %v1202_v18, 0.0 }
 0x433   :  { %1721 = vmatmul.mubr.msk.f32.vlgmr.msra.gmra.mrb[12].mxu0 %vm1215_vm7, %v1203_v20 }
 0x434   :  { %1886 = vmatpush3.bf16.msra.mxu0 %v1885_v19  ;;  %1731 = vmatprep.mubr.msk.f32.mxu0 %vm2008_vm5, %v2005_v0 }
 0x435   :  { %1887 = vmatprep.subr.bf16.mxu0 %v2007_v54  ;;  %v1483_v54 = vld [vmem:[%s2434_s10] ss:$0 sm:$0xff]  ;;  %s1413_s10 = sshll.u32 %s2011_s9, 4  ;;  %s1414_s10 = int_to_ptr.vmem [resolvable:$true] %s1413_s10 }
 0x436   :  { %s1973_s26 = scalar_lea.vmem %s1414_s10, 32  ;;  %p1978_p3 = scmp.lt.s32.totalorder %s1414_s10, %s1414_s10 }
 0x437   :  { %p1974_p2 = scmp.ne.s32.totalorder %s1414_s10, %s1973_s26  ;;  %p1979_p4 = scmp.lt.s32.totalorder %s1973_s26, %s1973_s26 }
 0x438   :  { %1889 = vmatpush3.bf16.msra.mxu0 %v1888_v23 }
 0x439   :  { %p1980_p5 = por %p1979_p4, %p1978_p3 }
 0x43b   :  { %p1981_p6 = pnand %p1980_p5, %p1974_p2 }
 0x506   :  { %v1285_v25 = vpop.f32.mrb[12].mxu0 }
 0x507   :  { %v1286_v26 = vadd.f32 %v1481_v24, %v1285_v25  ;;  %v1722_v27 = vpop.f32.mrb[13].mxu0 }
 0x509   :  { %v1289_v0 = vmax.f32 %v1286_v26, 0.0 }
 0x50b   :  { %1732 = vmatmul.mubr.msk.f32.vlgmr.msra.gmra.mrb[14].mxu0 %vm1215_vm7, %v1289_v0 }
 0x5de   :  { %v1370_v28 = vpop.f32.mrb[14].mxu0 }
 0x5df   :  { %v1371_v29 = vadd.f32 %v1483_v54, %v1370_v28  ;;  %v1733_v30 = vpop.f32.mrb[15].mxu0 }
 0x5e1   :  { %v1389_v31 = vsel %vm1388_vm8, %v1371_v29, -inf  ;;  %v1375_v32 = vsel %vm1374_vm9, %v1371_v29, -inf }
 0x5e2   :  { %1390 = vmax.xlane.f32.xlu0 %v1389_v31  ;;  %1376 = vmax.xlane.f32.xlu1 %v1375_v32 }
 0x66f   :  { %v1391_v33 = vpop.xlane.xlu0 %1390  ;;  %v1377_v34 = vpop.xlane.xlu1 %1376 }
 0x670   :  { %v1392_v35 = vsub.f32 %v1371_v29, %v1391_v33  ;;  %v1378_v36 = vsub.f32 %v1371_v29, %v1377_v34 }
 0x672   :  { %v1393_v37 = vmul.f32 1.442695, %v1392_v35  ;;  %v1379_v38 = vmul.f32 1.442695, %v1378_v36 }
 0x674   :  { %1921 = vpow2.f32 %v1393_v37 }
 0x675   :  { %1923 = vpow2.f32 %v1379_v38 }
 0x67e   :  { %v1922_v39 = vpop.eup %1921 }
 0x67f   :  { %v1924_v40 = vpop.eup %1923  ;;  %1396 = vrot.lane.b32.xlu0 %v1922_v39, %s2010_s8 }
 0x680   :  { %v1381_v41 = vsel %vm1374_vm9, %v1924_v40, 0.0 }
 0x681   :  { %1382 = vadd.xlane.f32.xlu1 %v1381_v41 }
 0x6f1   :  { %v1397_v42 = vpop.permute.xlu0 %1396 }
 0x6f2   :  { %v1400_v43 = vsel %vm1399_vm10, %v1397_v42, 0.0 }
 0x6f3   :  { %1401 = vadd.xlane.f32.xlu1 %v1400_v43 }
 0x70e   :  { %v1383_v44 = vpop.xlane.xlu1 %1382 }
 0x70f   :  { %1925 = vlog2.f32 %v1383_v44 }
 0x719   :  { %v1926_v45 = vpop.eup %1925 }
 0x71a   :  { %v1385_v46 = vmul.f32 0.6931472, %v1926_v45 }
 0x71c   :  { %v1386_v47 = vsub.f32 %v1378_v36, %v1385_v46 }
 0x71e   :  { %1387 = vst.msk [vmem:[#allocation10] sm:$0x3] %vm1374_vm9, %v1386_v47 }
 0x780   :  { %v1402_v48 = vpop.xlane.xlu1 %1401 }
 0x781   :  { %1927 = vlog2.f32 %v1402_v48 }
 0x78b   :  { %v1928_v49 = vpop.eup %1927 }
 0x78c   :  { %v1404_v50 = vmul.f32 0.6931472, %v1928_v49 }
 0x78e   :  { %v1405_v51 = vsub.f32 %v1392_v35, %v1404_v50 }
 0x790   :  { %1406 = vst.msk [vmem:[#allocation10] sm:$0x3] %vm1388_vm8, %v1405_v51 }
 0x791   :  { %1984 = shalt.err (!%p1981_p6)
}
 0x792   :  { %s1985_s29 = scalar_lea.hbm %s2435_s11, 32 }
 0x793   :  { %p1986_p7 = scmp.ne.s32.totalorder %s2435_s11, %s1985_s29  ;;  %p1989_p8 = scmp.lt.u32.totalorder %s1985_s29, %s2435_s11 }
 0x795   :  { %p1991_p9 = pnand %p1989_p8, %p1986_p7 }
 0x797   :  { %1994 = shalt.err (!%p1991_p9)
}
 0x798   :  { %1416 = dma.vmem_to_hbm [thread:$0]  %s1414_s10, 32, %s2435_s11, [#allocation7]  }
 0x799   :  { %1999 = dma.done.wait [#allocation7], 32  }
 0x79a   :  { %2000 = vsyncadd [#allocation7], 4294967264 }
 0x79b   :  { %1420 = vsyncpa [#allocation6], 1 }
 0x79c   :  { %1421 = vsyncpa [#allocation9], 1 }
 0x79d   :  { %1422 = vsyncpa [#allocation7], 1 }

</bundles_post_ra>
